<compile_context>
chip_gen: v7x
topology: tpu7x:2x2x1
jax: 0.10.0
libtpu: 0.0.40
codegen_flags: <defaults>
</compile_context>

<pallas_src>
import jax
import jax.numpy as jnp
from jax import lax
from jax.experimental import pallas as pl
from jax.experimental.pallas import tpu as pltpu

EPS = 1e-5

# Padded feature widths (lane/sublane friendly; blocks equal full arrays).
IN_PAD = 32     # 27  -> 32
H1_PAD = 256    # 200 -> 256
H2_PAD = 512    # 400 -> 512


def mynet_kernel(x_ref, w1_ref, w2_ref, slab_ref, out_ref):
    # slab rows: 0=gamma1, 1=beta1, 2=gamma2, 3=beta2, 4=w3^T, 5=[b3,0,...]
    slab = slab_ref[...]                                             # (8, 512) f32
    x = x_ref[...].astype(jnp.bfloat16)                              # (B, 32)

    # ---- L1: Linear(27, 200) padded to (32, 256); bias dropped (cancels in BN) ----
    g1 = jnp.dot(x, w1_ref[...], preferred_element_type=jnp.float32)  # (B, 256) f32

    # ---- B1: BatchNorm1d (training-mode batch stats), folded affine, f32 ----
    mu1 = jnp.mean(g1, axis=0, keepdims=True)
    d1 = g1 - mu1
    var1 = jnp.mean(d1 * d1, axis=0, keepdims=True)                  # biased, matches PyTorch
    a1 = slab[0:1, :H1_PAD] * lax.rsqrt(var1 + EPS)                  # gamma1 * rsqrt(var+eps)
    f1 = jnp.maximum(d1 * a1 + slab[1:2, :H1_PAD], 0.0)              # one FMA + relu

    # ---- L2: Linear(200, 400) padded to (256, 512); bias dropped ----
    g2 = jnp.dot(f1.astype(jnp.bfloat16), w2_ref[...],
                 preferred_element_type=jnp.float32)                 # (B, 512) f32

    # ---- B2: BatchNorm1d, folded affine, f32 ----
    mu2 = jnp.mean(g2, axis=0, keepdims=True)
    d2 = g2 - mu2
    var2 = jnp.mean(d2 * d2, axis=0, keepdims=True)
    a2 = slab[2:3, :] * lax.rsqrt(var2 + EPS)
    f2 = jnp.maximum(d2 * a2 + slab[3:4, :], 0.0)

    # ---- L: Linear(400, 1) as VPU broadcast-mul + lane reduction (no MXU) ----
    g = jnp.sum(f2 * slab[4:5, :], axis=-1, keepdims=True) + slab[5:6, 0:1]
    out_ref[...] = g.astype(out_ref.dtype)                           # (B, 1)


def _pad2(a, rows, cols):
    r, c = a.shape
    return jnp.pad(a, ((0, rows - r), (0, cols - c)))


def pack_params(p):
    """One-time packing: pad weights, cast matmul weights to bf16, merge the
    small per-feature vectors into a single f32 slab.  Call ONCE, outside the
    per-call path."""
    w1p = _pad2(p["w1"], IN_PAD, H1_PAD).astype(jnp.bfloat16)        # (32, 256) bf16
    w2p = _pad2(p["w2"], H1_PAD, H2_PAD).astype(jnp.bfloat16)        # (256, 512) bf16
    # Slab stays f32 (BN math is f32).  Padded gamma columns MUST stay zero so
    # padded features remain exactly 0 through BN+ReLU.
    slab = jnp.zeros((8, H2_PAD), jnp.float32)
    slab = slab.at[0, :200].set(p["gamma1"][0])
    slab = slab.at[1, :200].set(p["beta1"][0])
    slab = slab.at[2, :400].set(p["gamma2"][0])
    slab = slab.at[3, :400].set(p["beta2"][0])
    slab = slab.at[4, :400].set(p["w3"][:, 0])
    slab = slab.at[5, 0].set(p["b3"][0, 0])
    return w1p, w2p, slab


def _vmem_limit_bytes(args, B):
    """Right-size the VMEM limit from actual operand + activation sizes."""
    in_bytes = sum(int(a.size) * a.dtype.itemsize for a in args)
    act_bytes = B * (IN_PAD + 2 * H1_PAD + 2 * H2_PAD + 8) * 4
    need = 2 * in_bytes + act_bytes + (1 << 20)          # double-buffer + slack
    return int(min(max(need, 4 << 20), 48 << 20))        # <= 48 MiB (v7x headroom)


def mynet_forward(x, w1p, w2p, slab):
    """x: (B, 27) float32; w1p/w2p/slab: output of pack_params (already packed)."""
    B = x.shape[0]
    x_pad = jnp.pad(x, ((0, 0), (0, IN_PAD - x.shape[1])))           # only per-call prep
    args = (x_pad, w1p, w2p, slab)
    # Small problem: single grid point, every operand is one full-array VMEM block.
    in_specs = [pl.BlockSpec(a.shape, lambda: (0, 0)) for a in args]
    return pl.pallas_call(
        mynet_kernel,
        out_shape=jax.ShapeDtypeStruct((B, 1), jnp.float32),
        in_specs=in_specs,
        out_specs=pl.BlockSpec((B, 1), lambda: (0, 0)),
        compiler_params=pltpu.CompilerParams(
            vmem_limit_bytes=_vmem_limit_bytes(args, B)),
    )(*args)


def init_params(key):
    """Deterministic synthetic parameters matching the nn.Module shapes."""
    ks = jax.random.split(key, 8)
    return {
        # Linear weights stored as (in, out) so the kernel does x @ W (+ b).
        "w1": jax.random.normal(ks[0], (27, 200), jnp.float32) * 0.1,
        "b1": jax.random.normal(ks[1], (1, 200), jnp.float32) * 0.05,
        "w2": jax.random.normal(ks[2], (200, 400), jnp.float32) * 0.05,
        "b2": jax.random.normal(ks[3], (1, 400), jnp.float32) * 0.05,
        "w3": jax.random.normal(ks[4], (400, 1), jnp.float32) * 0.05,
        "b3": jax.random.normal(ks[5], (1, 1), jnp.float32) * 0.05,
        # BatchNorm affine params (PyTorch default ones/zeros; perturbed, deterministic).
        "gamma1": 1.0 + 0.1 * jax.random.normal(ks[6], (1, 200), jnp.float32),
        "beta1": jnp.zeros((1, 200), jnp.float32),
        "gamma2": 1.0 + 0.1 * jax.random.normal(ks[7], (1, 400), jnp.float32),
        "beta2": jnp.zeros((1, 400), jnp.float32),
    }


def mynet_reference(x, p):
    """Pure-JAX f32 reference of the PyTorch forward (training-mode BatchNorm1d)."""
    g1 = x @ p["w1"] + p["b1"]
    mu, var = jnp.mean(g1, 0, keepdims=True), jnp.var(g1, 0, keepdims=True)
    f1 = jnp.maximum((g1 - mu) / jnp.sqrt(var + EPS) * p["gamma1"] + p["beta1"], 0.0)
    g2 = f1 @ p["w2"] + p["b2"]
    mu, var = jnp.mean(g2, 0, keepdims=True), jnp.var(g2, 0, keepdims=True)
    f2 = jnp.maximum((g2 - mu) / jnp.sqrt(var + EPS) * p["gamma2"] + p["beta2"], 0.0)
    return f2 @ p["w3"] + p["b3"]


def mynet_kernel_math_reference(x, p):
    """Pure-JAX reference of the *kernel's* math (bf16 matmul weights, biases
    dropped — equivalent under training-mode BN)."""
    w1b, w2b = p["w1"].astype(jnp.bfloat16), p["w2"].astype(jnp.bfloat16)
    g1 = jnp.dot(x.astype(jnp.bfloat16), w1b, preferred_element_type=jnp.float32)
    mu1 = g1.mean(0, keepdims=True)
    d1 = g1 - mu1
    var1 = (d1 * d1).mean(0, keepdims=True)
    f1 = jnp.maximum(d1 * (p["gamma1"] * lax.rsqrt(var1 + EPS)) + p["beta1"], 0.0)
    g2 = jnp.dot(f1.astype(jnp.bfloat16), w2b, preferred_element_type=jnp.float32)
    mu2 = g2.mean(0, keepdims=True)
    d2 = g2 - mu2
    var2 = (d2 * d2).mean(0, keepdims=True)
    f2 = jnp.maximum(d2 * (p["gamma2"] * lax.rsqrt(var2 + EPS)) + p["beta2"], 0.0)
    return jnp.sum(f2 * p["w3"].T, axis=-1, keepdims=True) + p["b3"]


if __name__ == "__main__":
    key = jax.random.PRNGKey(0)
    k_x, k_p = jax.random.split(key)

    B = 8                                   # batch (BatchNorm training mode needs B > 1)
    x = jax.random.normal(k_x, (B, 27), jnp.float32)
    params = init_params(k_p)

    # One-time packing (hoisted out of the per-call path).
    packed = tuple(jax.block_until_ready(a) for a in pack_params(params))

    fwd = jax.jit(mynet_forward)
    out = jax.block_until_ready(fwd(x, *packed))

    ref_f32 = jax.block_until_ready(mynet_reference(x, params))
    ref_knl = jax.block_until_ready(mynet_kernel_math_reference(x, params))

    assert out.shape == (B, 1)
    # Tight check against a reference that mirrors the kernel's math exactly.
    assert jnp.allclose(out, ref_knl, atol=1e-3, rtol=1e-3), "mismatch vs kernel-math reference"
    # Loose semantic check against the true f32 module forward (bf16 weight drift).
    assert jnp.allclose(out, ref_f32, atol=1e-1, rtol=1e-1), "mismatch vs f32 module reference"

    print("KERNEL_OK")
</pallas_src>

<mosaic_0001>
module attributes {stable_mosaic.version = 11 : i64} {
  func.func @mynet_kernel(%arg0: memref<8x32xf32, #tpu.memory_space<vmem>>, %arg1: memref<32x256xbf16, #tpu.memory_space<vmem>>, %arg2: memref<256x512xbf16, #tpu.memory_space<vmem>>, %arg3: memref<8x512xf32, #tpu.memory_space<vmem>>, %arg4: memref<8x1xf32, #tpu.memory_space<vmem>>) attributes {dimension_semantics = [], scalar_prefetch = 0 : i64, scratch_operands = 0 : i64, tpu.core_type = #tpu.core_type<tc>} {
    %c0 = arith.constant 0 : index
    %c0_0 = arith.constant 0 : index
    %0 = vector.load %arg3[%c0, %c0_0] : memref<8x512xf32, #tpu.memory_space<vmem>>, vector<8x512xf32>
    %c0_1 = arith.constant 0 : index
    %c0_2 = arith.constant 0 : index
    %1 = vector.load %arg0[%c0_1, %c0_2] : memref<8x32xf32, #tpu.memory_space<vmem>>, vector<8x32xf32>
    %2 = arith.truncf %1 : vector<8x32xf32> to vector<8x32xbf16>
    %c0_3 = arith.constant 0 : index
    %c0_4 = arith.constant 0 : index
    %3 = vector.load %arg1[%c0_3, %c0_4] : memref<32x256xbf16, #tpu.memory_space<vmem>>, vector<32x256xbf16>
    %cst = arith.constant dense<0.000000e+00> : vector<8x256xf32>
    %4 = tpu.matmul %2, %3, %cst {dimension_numbers = #tpu.dot_dimension_numbers<[1], [0], [0], [1], [0, 0, 1, 1], [], []>} : vector<8x32xbf16>, vector<32x256xbf16>, vector<8x256xf32> -> vector<8x256xf32>
    %cst_5 = arith.constant dense<0.000000e+00> : vector<256xf32>
    %5 = vector.multi_reduction <add>, %4, %cst_5 [0] : vector<8x256xf32> to vector<256xf32>
    %6 = vector.shape_cast %5 : vector<256xf32> to vector<1x256xf32>
    %cst_6 = arith.constant 8.000000e+00 : f32
    %7 = vector.broadcast %cst_6 : f32 to vector<1x256xf32>
    %8 = arith.divf %6, %7 : vector<1x256xf32>
    %9 = vector.broadcast %8 : vector<1x256xf32> to vector<8x256xf32>
    %10 = arith.subf %4, %9 : vector<8x256xf32>
    %11 = arith.mulf %10, %10 : vector<8x256xf32>
    %cst_7 = arith.constant dense<0.000000e+00> : vector<256xf32>
    %12 = vector.multi_reduction <add>, %11, %cst_7 [0] : vector<8x256xf32> to vector<256xf32>
    %13 = vector.shape_cast %12 : vector<256xf32> to vector<1x256xf32>
    %cst_8 = arith.constant 8.000000e+00 : f32
    %14 = vector.broadcast %cst_8 : f32 to vector<1x256xf32>
    %15 = arith.divf %13, %14 : vector<1x256xf32>
    %16 = vector.extract_strided_slice %0 {offsets = [0, 0], sizes = [1, 256], strides = [1, 1]} : vector<8x512xf32> to vector<1x256xf32>
    %cst_9 = arith.constant 9.99999974E-6 : f32
    %17 = vector.broadcast %cst_9 : f32 to vector<1x256xf32>
    %18 = arith.addf %15, %17 : vector<1x256xf32>
    %19 = math.rsqrt %18 : vector<1x256xf32>
    %20 = arith.mulf %16, %19 : vector<1x256xf32>
    %21 = vector.broadcast %20 : vector<1x256xf32> to vector<8x256xf32>
    %22 = arith.mulf %10, %21 : vector<8x256xf32>
    %23 = vector.extract_strided_slice %0 {offsets = [1, 0], sizes = [1, 256], strides = [1, 1]} : vector<8x512xf32> to vector<1x256xf32>
    %24 = vector.broadcast %23 : vector<1x256xf32> to vector<8x256xf32>
    %25 = arith.addf %22, %24 : vector<8x256xf32>
    %cst_10 = arith.constant 0.000000e+00 : f32
    %26 = vector.broadcast %cst_10 : f32 to vector<8x256xf32>
    %27 = arith.maximumf %25, %26 : vector<8x256xf32>
    %28 = arith.truncf %27 : vector<8x256xf32> to vector<8x256xbf16>
    %c0_11 = arith.constant 0 : index
    %c0_12 = arith.constant 0 : index
    %29 = vector.load %arg2[%c0_11, %c0_12] : memref<256x512xbf16, #tpu.memory_space<vmem>>, vector<256x512xbf16>
    %cst_13 = arith.constant dense<0.000000e+00> : vector<8x512xf32>
    %30 = tpu.matmul %28, %29, %cst_13 {dimension_numbers = #tpu.dot_dimension_numbers<[1], [0], [0], [1], [0, 0, 1, 1], [], []>} : vector<8x256xbf16>, vector<256x512xbf16>, vector<8x512xf32> -> vector<8x512xf32>
    %cst_14 = arith.constant dense<0.000000e+00> : vector<512xf32>
    %31 = vector.multi_reduction <add>, %30, %cst_14 [0] : vector<8x512xf32> to vector<512xf32>
    %32 = vector.shape_cast %31 : vector<512xf32> to vector<1x512xf32>
    %cst_15 = arith.constant 8.000000e+00 : f32
    %33 = vector.broadcast %cst_15 : f32 to vector<1x512xf32>
    %34 = arith.divf %32, %33 : vector<1x512xf32>
    %35 = vector.broadcast %34 : vector<1x512xf32> to vector<8x512xf32>
    %36 = arith.subf %30, %35 : vector<8x512xf32>
    %37 = arith.mulf %36, %36 : vector<8x512xf32>
    %cst_16 = arith.constant dense<0.000000e+00> : vector<512xf32>
    %38 = vector.multi_reduction <add>, %37, %cst_16 [0] : vector<8x512xf32> to vector<512xf32>
    %39 = vector.shape_cast %38 : vector<512xf32> to vector<1x512xf32>
    %cst_17 = arith.constant 8.000000e+00 : f32
    %40 = vector.broadcast %cst_17 : f32 to vector<1x512xf32>
    %41 = arith.divf %39, %40 : vector<1x512xf32>
    %42 = vector.extract_strided_slice %0 {offsets = [2, 0], sizes = [1, 512], strides = [1, 1]} : vector<8x512xf32> to vector<1x512xf32>
    %cst_18 = arith.constant 9.99999974E-6 : f32
    %43 = vector.broadcast %cst_18 : f32 to vector<1x512xf32>
    %44 = arith.addf %41, %43 : vector<1x512xf32>
    %45 = math.rsqrt %44 : vector<1x512xf32>
    %46 = arith.mulf %42, %45 : vector<1x512xf32>
    %47 = vector.broadcast %46 : vector<1x512xf32> to vector<8x512xf32>
    %48 = arith.mulf %36, %47 : vector<8x512xf32>
    %49 = vector.extract_strided_slice %0 {offsets = [3, 0], sizes = [1, 512], strides = [1, 1]} : vector<8x512xf32> to vector<1x512xf32>
    %50 = vector.broadcast %49 : vector<1x512xf32> to vector<8x512xf32>
    %51 = arith.addf %48, %50 : vector<8x512xf32>
    %cst_19 = arith.constant 0.000000e+00 : f32
    %52 = vector.broadcast %cst_19 : f32 to vector<8x512xf32>
    %53 = arith.maximumf %51, %52 : vector<8x512xf32>
    %54 = vector.extract_strided_slice %0 {offsets = [4, 0], sizes = [1, 512], strides = [1, 1]} : vector<8x512xf32> to vector<1x512xf32>
    %55 = vector.broadcast %54 : vector<1x512xf32> to vector<8x512xf32>
    %56 = arith.mulf %53, %55 : vector<8x512xf32>
    %cst_20 = arith.constant dense<0.000000e+00> : vector<8xf32>
    %57 = vector.multi_reduction <add>, %56, %cst_20 [1] : vector<8x512xf32> to vector<8xf32>
    %58 = vector.shape_cast %57 : vector<8xf32> to vector<8x1xf32>
    %59 = vector.extract_strided_slice %0 {offsets = [5, 0], sizes = [1, 1], strides = [1, 1]} : vector<8x512xf32> to vector<1x1xf32>
    %60 = vector.broadcast %59 : vector<1x1xf32> to vector<8x1xf32>
    %61 = arith.addf %58, %60 : vector<8x1xf32>
    %c0_21 = arith.constant 0 : index
    %c0_22 = arith.constant 0 : index
    %62 = vector.load %arg4[%c0_21, %c0_22] : memref<8x1xf32, #tpu.memory_space<vmem>>, vector<8x1xf32>
    tpu.vector_store %arg4[%c0_21, %c0_22], %61 {strides = array<i32>} : memref<8x1xf32, #tpu.memory_space<vmem>>, vector<8x1xf32>,
    return
  }
}

</mosaic_0001>

<bundles_post_ra>
// kernel: mynet_forward.1
= control target key start
LH: loop header
LB: loop body
LE: loop exit
PB: predicated region body
PF: predicated region fallthrough
CT: control target
= control target key end

     0   :  { %9 = vsyncpa [#allocation3], 0  ;;  %s1193_s0 = inlined_call_operand.vmem [shape: f32[8,32], index: 0, kind: input, shape index: {}]   ;;  %s1194_s1 = inlined_call_operand.hbm [shape: bf16[32,256], index: 1, kind: input, shape index: {}]   ;;  %s1195_s2 = inlined_call_operand.hbm [shape: bf16[256,512], index: 2, kind: input, shape index: {}]   ;;  %s1196_s3 = inlined_call_operand.hbm [shape: f32[8,512], index: 3, kind: input, shape index: {}]   ;;  %s1197_s4 = inlined_call_operand.vmem [shape: f32[8,1], index: 4, kind: output, shape index: {}]  }
   0x1   :  { %10 = vsyncpa [#allocation5], 0  ;;  %s1080_s15 = smov [#allocation4]   ;;  %s1010_s19 = scalar_lea.hbm %s1195_s2, 8192 }
   0x2   :  { %s30_s16 = sshll.u32 %s1080_s15, 4  ;;  %p1011_p0 = scmp.ne.s32.totalorder %s1195_s2, %s1010_s19  ;;  %s31_s16 = int_to_ptr.vmem [resolvable:$true] %s30_s16 }
   0x3   :  { %p1014_p1 = scmp.lt.u32.totalorder %s1010_s19, %s1195_s2 }
   0x5   :  { %p1016_p2 = pnand %p1014_p1, %p1011_p0 }
   0x7   :  { %1019 = shalt.err (!%p1016_p2)
}
   0x8   :  { %s1020_s24 = scalar_lea.vmem %s31_s16, 8192  ;;  %p1025_p4 = scmp.lt.s32.totalorder %s31_s16, %s31_s16 }
   0x9   :  { %p1021_p3 = scmp.ne.s32.totalorder %s31_s16, %s1020_s24  ;;  %p1026_p5 = scmp.lt.s32.totalorder %s1020_s24, %s1020_s24 }
   0xb   :  { %p1027_p6 = por %p1026_p5, %p1025_p4 }
   0xd   :  { %p1028_p7 = pnand %p1027_p6, %p1021_p3 }
   0xf   :  { %1031 = shalt.err (!%p1028_p7)
}
  0x10   :  { %s1081_s25 = smov 256   ;;  %s1082_s26 = smov 16  }
  0x11   :  { %36 = dma.hbm_to_vmem [thread:$0]  %s1195_s2, 8192, %s31_s16, [#allocation5], %s1081_s25, %s1081_s25, %s1082_s26  }
  0x12   :  { %s1083_s29 = smov [#allocation2]   ;;  %s1032_s7 = scalar_lea.hbm %s1194_s1, 512 }
  0x13   :  { %s18_s30 = sshll.u32 %s1083_s29, 4  ;;  %p1033_p8 = scmp.ne.s32.totalorder %s1194_s1, %s1032_s7  ;;  %s19_s30 = int_to_ptr.vmem [resolvable:$true] %s18_s30 }
  0x14   :  { %p1036_p9 = scmp.lt.u32.totalorder %s1032_s7, %s1194_s1 }
  0x16   :  { %p1038_p10 = pnand %p1036_p9, %p1033_p8 }
  0x18   :  { %1041 = shalt.err (!%p1038_p10)
}
  0x19   :  { %s1042_s12 = scalar_lea.vmem %s19_s30, 512  ;;  %p1047_p12 = scmp.lt.s32.totalorder %s19_s30, %s19_s30 }
  0x1a   :  { %p1043_p11 = scmp.ne.s32.totalorder %s19_s30, %s1042_s12  ;;  %p1048_p13 = scmp.lt.s32.totalorder %s1042_s12, %s1042_s12 }
  0x1c   :  { %p1049_p0 = por %p1048_p13, %p1047_p12 }
  0x1e   :  { %p1050_p1 = pnand %p1049_p0, %p1043_p11 }
  0x20   :  { %1053 = shalt.err (!%p1050_p1)
}
  0x21   :  { %s1084_s2 = smov 128   ;;  %s1085_s13 = smov 8  }
  0x22   :  { %24 = dma.hbm_to_vmem [thread:$0]  %s1194_s1, 512, %s19_s30, [#allocation3], %s1084_s2, %s1084_s2, %s1085_s13  }
  0x23   :  { %s1086_s16 = smov [#allocation6]   ;;  %s1054_s20 = scalar_lea.hbm %s1196_s3, 512 }
  0x24   :  { %s43_s17 = sshll.u32 %s1086_s16, 4  ;;  %p1055_p2 = scmp.ne.s32.totalorder %s1196_s3, %s1054_s20  ;;  %s44_s17 = int_to_ptr.vmem [resolvable:$true] %s43_s17 }
  0x25   :  { %p1058_p3 = scmp.lt.u32.totalorder %s1054_s20, %s1196_s3 }
  0x27   :  { %p1060_p4 = pnand %p1058_p3, %p1055_p2 }
  0x29   :  { %1063 = shalt.err (!%p1060_p4)
}
  0x2a   :  { %s1064_s25 = scalar_lea.vmem %s44_s17, 512  ;;  %p1069_p6 = scmp.lt.s32.totalorder %s44_s17, %s44_s17 }
  0x2b   :  { %p1065_p5 = scmp.ne.s32.totalorder %s44_s17, %s1064_s25  ;;  %p1070_p7 = scmp.lt.s32.totalorder %s1064_s25, %s1064_s25 }
  0x2d   :  { %p1071_p8 = por %p1070_p7, %p1069_p6 }
  0x2f   :  { %p1072_p9 = pnand %p1071_p8, %p1065_p5 }
  0x31   :  { %1075 = shalt.err (!%p1072_p9)
}
  0x32   :  { %46 = dma.hbm_to_vmem [thread:$0]  %s1196_s3, 512, %s44_s17, [#allocation5]  }
  0x33   :  { %1076 = dma.done.wait [#allocation3], 512  }
  0x34   :  { %1077 = vsyncadd [#allocation3], 4294966784 }
  0x35   :  { %1078 = dma.done.wait [#allocation5], 8704  }
  0x36   :  { %1079 = vsyncadd [#allocation5], 4294958592  ;;  %v1087_v0 = vmov 0   ;;  %v896_v1 = vld [vmem:[#allocation2 + $0x4] ss:$8 sps:$4 sm:$0xff]   ;;  %vm87_vm0 = vcmask 261120  }
  0x37   :  { %123 = vmatprep.mubr.bf16.mxu0 %v1087_v0  ;;  %v898_v2 = vld [vmem:[#allocation2] ss:$8 sps:$4 sm:$0xff]   ;;  %91 = vmatprep.subr.bf16.mxu0 %v896_v1  ;;  %v899_v3 = vld [vmem:[#allocation2 + $0x14] ss:$8 sps:$4 sm:$0xff]   ;;  %v901_v4 = vld [vmem:[#allocation2 + $0x10] ss:$8 sps:$4 sm:$0xff]  }
  0x38   :  { %v61_v5 = vld [vmem:[%s1193_s0] sm:$0xff]  ;;  %92 = vmatpush1.bf16.msra.mxu0 %v898_v2  ;;  %v904_v7 = vld [vmem:[#allocation4 + $0x8] ss:$16 sps:$4 sm:$0xff]   ;;  %v906_v8 = vld [vmem:[#allocation4 + $0xc] ss:$16 sps:$4 sm:$0xff]   ;;  %vm811_vm1 = vcmask 7168  }
  0x39   :  { %v902_v6 = vld [vmem:[#allocation4 + $0x4] ss:$16 sps:$4 sm:$0xff]   ;;  %93 = vmatprep.subr.bf16.mxu0 %v899_v3  ;;  %v907_v9 = vld [vmem:[#allocation4] ss:$16 sps:$4 sm:$0xff]   ;;  %v62_v10 = vpack.c.bf16 %v61_v5, %v61_v5  ;;  %v912_v12 = vld [vmem:[#allocation4 + $0x2c] ss:$16 sps:$4 sm:$0xff]  }
  0x3a   :  { %579 = vmatprep.subr.bf16.mxu1 %v902_v6  ;;  %v908_v11 = vld [vmem:[#allocation4 + $0x24] ss:$16 sps:$4 sm:$0xff]   ;;  %v910_v13 = vld [vmem:[#allocation4 + $0x28] ss:$16 sps:$4 sm:$0xff]   ;;  %v913_v14 = vld [vmem:[#allocation4 + $0x20] ss:$16 sps:$4 sm:$0xff]  }
  0x3b   :  { %580 = vmatpush1.bf16.msra.mxu1 %v907_v9  ;;  %v914_v15 = vld [vmem:[#allocation4 + $0x44] ss:$16 sps:$4 sm:$0xff]   ;;  %v918_v16 = vld [vmem:[#allocation4 + $0x4c] ss:$16 sps:$4 sm:$0xff]   ;;  %v916_v17 = vld [vmem:[#allocation4 + $0x48] ss:$16 sps:$4 sm:$0xff]  }
  0x3c   :  { %94 = vmatpush1.bf16.msra.mxu0 %v901_v4  ;;  %581 = vmatprep.subr.bf16.mxu1 %v908_v11  ;;  %v919_v18 = vld [vmem:[#allocation4 + $0x40] ss:$16 sps:$4 sm:$0xff]   ;;  %v920_v19 = vld [vmem:[#allocation4 + $0x64] ss:$16 sps:$4 sm:$0xff]   ;;  %v924_v20 = vld [vmem:[#allocation4 + $0x6c] ss:$16 sps:$4 sm:$0xff]  }
  0x3d   :  { %620 = vmatprep.subr.bf16.mxu0 %v906_v8  ;;  %v922_v21 = vld [vmem:[#allocation4 + $0x68] ss:$16 sps:$4 sm:$0xff]   ;;  %v925_v22 = vld [vmem:[#allocation4 + $0x60] ss:$16 sps:$4 sm:$0xff]   ;;  %v926_v23 = vld [vmem:[#allocation4 + $0x84] ss:$16 sps:$4 sm:$0xff]  }
  0x3e   :  { %v930_v24 = vld [vmem:[#allocation4 + $0x8c] ss:$16 sps:$4 sm:$0xff]   ;;  %v928_v25 = vld [vmem:[#allocation4 + $0x88] ss:$16 sps:$4 sm:$0xff]   ;;  %v931_v26 = vld [vmem:[#allocation4 + $0x80] ss:$16 sps:$4 sm:$0xff]  }
  0x3f   :  { %823 = vmatmul.mubr.msk.bf16.vlgmr.msra.gmra.mrb[0].mxu0 %vm87_vm0, %v62_v10  ;;  %582 = vmatpush1.bf16.msra.mxu1 %v913_v14  ;;  %v932_v27 = vld [vmem:[#allocation4 + $0xa4] ss:$16 sps:$4 sm:$0xff]   ;;  %v936_v28 = vld [vmem:[#allocation4 + $0xac] ss:$16 sps:$4 sm:$0xff]   ;;  %v934_v29 = vld [vmem:[#allocation4 + $0xa8] ss:$16 sps:$4 sm:$0xff]  }
  0x40   :  { %621 = vmatpush1.bf16.msra.mxu0 %v904_v7  ;;  %583 = vmatprep.subr.bf16.mxu1 %v914_v15  ;;  %v937_v30 = vld [vmem:[#allocation4 + $0xa0] ss:$16 sps:$4 sm:$0xff]   ;;  %v938_v31 = vld [vmem:[#allocation4 + $0xc4] ss:$16 sps:$4 sm:$0xff]   ;;  %v942_v32 = vld [vmem:[#allocation4 + $0xcc] ss:$16 sps:$4 sm:$0xff]  }
  0x41   :  { %622 = vmatprep.subr.bf16.mxu0 %v912_v12  ;;  %v940_v33 = vld [vmem:[#allocation4 + $0xc8] ss:$16 sps:$4 sm:$0xff]   ;;  %v943_v34 = vld [vmem:[#allocation4 + $0xc0] ss:$16 sps:$4 sm:$0xff]   ;;  %v944_v35 = vld [vmem:[#allocation4 + $0xe4] ss:$16 sps:$4 sm:$0xff]  }
  0x42   :  { %v948_v36 = vld [vmem:[#allocation4 + $0xec] ss:$16 sps:$4 sm:$0xff]   ;;  %v946_v37 = vld [vmem:[#allocation4 + $0xe8] ss:$16 sps:$4 sm:$0xff]   ;;  %v949_v38 = vld [vmem:[#allocation4 + $0xe0] ss:$16 sps:$4 sm:$0xff]  }
  0x43   :  { %584 = vmatpush1.bf16.msra.mxu1 %v919_v18  ;;  %v950_v39 = vld [vmem:[#allocation4 + $0x104] ss:$16 sps:$4 sm:$0xff]   ;;  %v954_v40 = vld [vmem:[#allocation4 + $0x10c] ss:$16 sps:$4 sm:$0xff]   ;;  %v952_v41 = vld [vmem:[#allocation4 + $0x108] ss:$16 sps:$4 sm:$0xff]  }
  0x44   :  { %623 = vmatpush1.bf16.msra.mxu0 %v910_v13  ;;  %585 = vmatprep.subr.bf16.mxu1 %v920_v19  ;;  %v955_v42 = vld [vmem:[#allocation4 + $0x100] ss:$16 sps:$4 sm:$0xff]   ;;  %v956_v43 = vld [vmem:[#allocation4 + $0x124] ss:$16 sps:$4 sm:$0xff]   ;;  %v960_v44 = vld [vmem:[#allocation4 + $0x12c] ss:$16 sps:$4 sm:$0xff]  }
  0x45   :  { %624 = vmatprep.subr.bf16.mxu0 %v918_v16  ;;  %v958_v45 = vld [vmem:[#allocation4 + $0x128] ss:$16 sps:$4 sm:$0xff]   ;;  %v961_v46 = vld [vmem:[#allocation4 + $0x120] ss:$16 sps:$4 sm:$0xff]   ;;  %v962_v47 = vld [vmem:[#allocation4 + $0x144] ss:$16 sps:$4 sm:$0xff]  }
  0x46   :  { %v966_v48 = vld [vmem:[#allocation4 + $0x14c] ss:$16 sps:$4 sm:$0xff]   ;;  %v964_v49 = vld [vmem:[#allocation4 + $0x148] ss:$16 sps:$4 sm:$0xff]   ;;  %v967_v50 = vld [vmem:[#allocation4 + $0x140] ss:$16 sps:$4 sm:$0xff]  }
  0x47   :  { %586 = vmatpush1.bf16.msra.mxu1 %v925_v22  ;;  %v968_v51 = vld [vmem:[#allocation4 + $0x164] ss:$16 sps:$4 sm:$0xff]   ;;  %v972_v52 = vld [vmem:[#allocation4 + $0x16c] ss:$16 sps:$4 sm:$0xff]   ;;  %v970_v53 = vld [vmem:[#allocation4 + $0x168] ss:$16 sps:$4 sm:$0xff]  }
  0x48   :  { %625 = vmatpush1.bf16.msra.mxu0 %v916_v17  ;;  %587 = vmatprep.subr.bf16.mxu1 %v926_v23  ;;  %v973_v54 = vld [vmem:[#allocation4 + $0x160] ss:$16 sps:$4 sm:$0xff]   ;;  %v974_v55 = vld [vmem:[#allocation4 + $0x184] ss:$16 sps:$4 sm:$0xff]   ;;  %v978_v56 = vld [vmem:[#allocation4 + $0x18c] ss:$16 sps:$4 sm:$0xff]  }
  0x49   :  { %626 = vmatprep.subr.bf16.mxu0 %v924_v20  ;;  %v976_v57 = vld [vmem:[#allocation4 + $0x188] ss:$16 sps:$4 sm:$0xff]   ;;  %v979_v58 = vld [vmem:[#allocation4 + $0x180] ss:$16 sps:$4 sm:$0xff]   ;;  %v980_v59 = vld [vmem:[#allocation4 + $0x1a4] ss:$16 sps:$4 sm:$0xff]  }
  0x4a   :  { %v984_v60 = vld [vmem:[#allocation4 + $0x1ac] ss:$16 sps:$4 sm:$0xff]   ;;  %v982_v61 = vld [vmem:[#allocation4 + $0x1a8] ss:$16 sps:$4 sm:$0xff]   ;;  %v985_v62 = vld [vmem:[#allocation4 + $0x1a0] ss:$16 sps:$4 sm:$0xff]  }
  0x4b   :  { %588 = vmatpush1.bf16.msra.mxu1 %v931_v26  ;;  %v986_v63 = vld [vmem:[#allocation4 + $0x1c4] ss:$16 sps:$4 sm:$0xff]   ;;  %v988_v0 = vld [vmem:[#allocation4 + $0x1c8] ss:$16 sps:$4 sm:$0xff]   ;;  %v990_v1 = vld [vmem:[#allocation4 + $0x1cc] ss:$16 sps:$4 sm:$0xff]  }
  0x4c   :  { %627 = vmatpush1.bf16.msra.mxu0 %v922_v21  ;;  %589 = vmatprep.subr.bf16.mxu1 %v932_v27  ;;  %v991_v2 = vld [vmem:[#allocation4 + $0x1c0] ss:$16 sps:$4 sm:$0xff]   ;;  %v992_v3 = vld [vmem:[#allocation4 + $0x1e4] ss:$16 sps:$4 sm:$0xff]   ;;  %v996_v4 = vld [vmem:[#allocation4 + $0x1ec] ss:$16 sps:$4 sm:$0xff]  }
  0x4d   :  { %628 = vmatprep.subr.bf16.mxu0 %v930_v24  ;;  %v994_v5 = vld [vmem:[#allocation4 + $0x1e8] ss:$16 sps:$4 sm:$0xff]   ;;  %v997_v6 = vld [vmem:[#allocation4 + $0x1e0] ss:$16 sps:$4 sm:$0xff]  }
  0x4f   :  { %590 = vmatpush1.bf16.msra.mxu1 %v937_v30 }
  0x50   :  { %629 = vmatpush1.bf16.msra.mxu0 %v928_v25  ;;  %591 = vmatprep.subr.bf16.mxu1 %v938_v31 }
  0x51   :  { %630 = vmatprep.subr.bf16.mxu0 %v936_v28 }
  0x53   :  { %592 = vmatpush1.bf16.msra.mxu1 %v943_v34 }
  0x54   :  { %631 = vmatpush1.bf16.msra.mxu0 %v934_v29  ;;  %593 = vmatprep.subr.bf16.mxu1 %v944_v35 }
  0x55   :  { %632 = vmatprep.subr.bf16.mxu0 %v942_v32 }
  0x57   :  { %594 = vmatpush1.bf16.msra.mxu1 %v949_v38 }
  0x58   :  { %633 = vmatpush1.bf16.msra.mxu0 %v940_v33  ;;  %595 = vmatprep.subr.bf16.mxu1 %v950_v39 }
  0x59   :  { %634 = vmatprep.subr.bf16.mxu0 %v948_v36 }
  0x5b   :  { %596 = vmatpush1.bf16.msra.mxu1 %v955_v42 }
  0x5c   :  { %635 = vmatpush1.bf16.msra.mxu0 %v946_v37  ;;  %597 = vmatprep.subr.bf16.mxu1 %v956_v43 }
  0x5d   :  { %636 = vmatprep.subr.bf16.mxu0 %v954_v40 }
  0x5f   :  { %598 = vmatpush1.bf16.msra.mxu1 %v961_v46 }
  0x60   :  { %637 = vmatpush1.bf16.msra.mxu0 %v952_v41  ;;  %599 = vmatprep.subr.bf16.mxu1 %v962_v47  ;;  %v1154_v47 = vld [vmem:[#allocation6] sm:$0xff] }
  0x61   :  { %638 = vmatprep.subr.bf16.mxu0 %v960_v44 }
  0x63   :  { %600 = vmatpush1.bf16.msra.mxu1 %v967_v50 }
  0x64   :  { %639 = vmatpush1.bf16.msra.mxu0 %v958_v45  ;;  %601 = vmatprep.subr.bf16.mxu1 %v968_v51  ;;  %v171_v45 = vlaneseq }
  0x65   :  { %640 = vmatprep.subr.bf16.mxu0 %v966_v48 }
  0x66   :  { %v1152_v46 = vshrl.u32 %v171_v45, 7 }
  0x67   :  { %602 = vmatpush1.bf16.msra.mxu1 %v973_v54 }
  0x68   :  { %641 = vmatpush1.bf16.msra.mxu0 %v964_v49  ;;  %603 = vmatprep.subr.bf16.mxu1 %v974_v55  ;;  %v173_v48 = vsub.s32 0, %v1152_v46  ;;  %v1157_v49 = vld [vmem:[#allocation6 + $0x8] sm:$0xff]  ;;  %v183_v50 = vsub.s32 1, %v1152_v46 }
  0x69   :  { %642 = vmatprep.subr.bf16.mxu0 %v972_v52 }
  0x6b   :  { %604 = vmatpush1.bf16.msra.mxu1 %v979_v58  ;;  %v188_v58 = vrot.slane %v1157_v49, %v183_v50 }
  0x6c   :  { %643 = vmatpush1.bf16.msra.mxu0 %v970_v53  ;;  %605 = vmatprep.subr.bf16.mxu1 %v980_v59 }
  0x6d   :  { %644 = vmatprep.subr.bf16.mxu0 %v978_v56  ;;  %v184_v56 = vrot.slane %v1154_v47, %v183_v50 }
  0x6f   :  { %606 = vmatpush1.bf16.msra.mxu1 %v985_v62 }
  0x70   :  { %645 = vmatpush1.bf16.msra.mxu0 %v976_v57  ;;  %607 = vmatprep.subr.bf16.mxu1 %v986_v63 }
  0x71   :  { %646 = vmatprep.subr.bf16.mxu0 %v984_v60 }
  0x73   :  { %608 = vmatpush1.bf16.msra.mxu1 %v991_v2 }
  0x74   :  { %647 = vmatpush1.bf16.msra.mxu0 %v982_v61  ;;  %609 = vmatprep.subr.bf16.mxu1 %v992_v3 }
  0x75   :  { %648 = vmatprep.subr.bf16.mxu0 %v990_v1 }
  0x77   :  { %610 = vmatpush1.bf16.msra.mxu1 %v997_v6 }
  0x78   :  { %649 = vmatpush1.bf16.msra.mxu0 %v988_v0 }
  0x79   :  { %650 = vmatprep.subr.bf16.mxu0 %v996_v4 }
  0x7c   :  { %651 = vmatpush1.bf16.msra.mxu0 %v994_v5 }
 0x112   :  { %v125_v7 = vpop.f32.mrb[0].mxu0 }
 0x113   :  { %v132_v8 = vrot.slane %v125_v7, 4  ;;  %v127_v9 = vpop.f32.mrb[1].mxu0 }
 0x114   :  { %v138_v10 = vrot.slane %v127_v9, 4  ;;  %v129_v11 = vpop.f32.mrb[2].mxu0 }
 0x115   :  { %v133_v12 = vadd.f32 %v132_v8, %v125_v7  ;;  %v130_v13 = vpop.f32.mrb[3].mxu0 }
 0x116   :  { %v139_v14 = vadd.f32 %v138_v10, %v127_v9 }
 0x117   :  { %v134_v15 = vrot.slane %v133_v12, 2 }
 0x118   :  { %v140_v16 = vrot.slane %v139_v14, 2 }
 0x119   :  { %v135_v17 = vadd.f32 %v134_v15, %v133_v12 }
 0x11a   :  { %v141_v18 = vadd.f32 %v140_v16, %v139_v14 }
 0x11b   :  { %v136_v19 = vrot.slane %v135_v17, 1 }
 0x11c   :  { %v142_v20 = vrot.slane %v141_v18, 1 }
 0x11d   :  { %v137_v21 = vadd.f32 %v136_v19, %v135_v17 }
 0x11e   :  { %v143_v22 = vadd.f32 %v142_v20, %v141_v18 }
 0x11f   :  { %v145_v23 = vmul.f32 0.125, %v137_v21 }
 0x120   :  { %v146_v24 = vmul.f32 0.125, %v143_v22 }
 0x121   :  { %v147_v25 = vsub.f32 %v125_v7, %v145_v23 }
 0x122   :  { %v148_v26 = vsub.f32 %v127_v9, %v146_v24 }
 0x123   :  { %v149_v27 = vmul.f32 %v147_v25, %v147_v25 }
 0x124   :  { %v150_v28 = vmul.f32 %v148_v26, %v148_v26 }
 0x125   :  { %v151_v29 = vrot.slane %v149_v27, 4 }
 0x126   :  { %v157_v30 = vrot.slane %v150_v28, 4 }
 0x127   :  { %v152_v31 = vadd.f32 %v151_v29, %v149_v27 }
 0x128   :  { %v158_v32 = vadd.f32 %v157_v30, %v150_v28 }
 0x129   :  { %v153_v33 = vrot.slane %v152_v31, 2 }
 0x12a   :  { %v159_v34 = vrot.slane %v158_v32, 2 }
 0x12b   :  { %v154_v35 = vadd.f32 %v153_v33, %v152_v31 }
 0x12c   :  { %v160_v36 = vadd.f32 %v159_v34, %v158_v32 }
 0x12d   :  { %v155_v37 = vrot.slane %v154_v35, 1 }
 0x12e   :  { %v161_v38 = vrot.slane %v160_v36, 1 }
 0x12f   :  { %v156_v39 = vadd.f32 %v155_v37, %v154_v35 }
 0x130   :  { %v162_v40 = vadd.f32 %v161_v38, %v160_v36 }
 0x131   :  { %v163_v41 = vmul.f32 0.125, %v156_v39 }
 0x132   :  { %v164_v42 = vmul.f32 0.125, %v162_v40 }
 0x133   :  { %v165_v43 = vadd.f32 1e-05, %v163_v41 }
 0x134   :  { %v166_v44 = vadd.f32 1e-05, %v164_v42 }
 0x135   :  { %998 = vrsqrt.f32 %v165_v43 }
 0x136   :  { %1000 = vrsqrt.f32 %v166_v44 }
 0x13f   :  { %v999_v51 = vpop.eup %998 }
 0x140   :  { %v1001_v52 = vpop.eup %1000  ;;  %v169_v53 = vmul.f32 %v999_v51, %v1154_v47 }
 0x141   :  { %v170_v54 = vmul.f32 %v1001_v52, %v1157_v49 }
 0x142   :  { %v174_v55 = vrot.slane %v169_v53, %v173_v48 }
 0x143   :  { %v178_v57 = vrot.slane %v170_v54, %v173_v48 }
 0x144   :  { %v179_v59 = vmul.f32 %v174_v55, %v147_v25 }
 0x145   :  { %v180_v60 = vmul.f32 %v178_v57, %v148_v26 }
 0x146   :  { %v189_v61 = vadd.f32 %v184_v56, %v179_v59 }
 0x147   :  { %v190_v62 = vadd.f32 %v188_v58, %v180_v60 }
 0x148   :  { %v191_v63 = vmax.f32 %v189_v61, 0.0 }
 0x149   :  { %v192_v0 = vmax.f32 %v190_v62, 0.0 }
 0x14a   :  { %v193_v2 = vpack.c.bf16 %v191_v63, %v191_v63 }
 0x14b   :  { %v194_v1 = vpack.c.bf16 %v192_v0, %v192_v0 }
 0x14d   :  { %611 = vmatprep.mubr.bf16.mxu1 %v194_v1  ;;  %652 = vmatprep.mubr.bf16.mxu0 %v194_v1 }
 0x14e   :  { %612 = vmatmul.mubr.bf16.vlgmr.msra.gmra.mrb[0].mxu1 %v193_v2  ;;  %653 = vmatmul.mubr.bf16.vlgmr.msra.gmra.mrb[4].mxu0 %v193_v2 }
 0x221   :  { %v613_v3 = vpop.f32.mrb[0].mxu1  ;;  %v654_v4 = vpop.f32.mrb[4].mxu0 }
 0x222   :  { %v661_v5 = vrot.slane %v613_v3, 4  ;;  %v673_v6 = vrot.slane %v654_v4, 4  ;;  %v615_v7 = vpop.f32.mrb[1].mxu1  ;;  %v656_v8 = vpop.f32.mrb[5].mxu0 }
 0x223   :  { %v667_v9 = vrot.slane %v615_v7, 4  ;;  %v679_v10 = vrot.slane %v656_v8, 4  ;;  %v617_v11 = vpop.f32.mrb[2].mxu1  ;;  %v658_v12 = vpop.f32.mrb[6].mxu0 }
 0x224   :  { %v662_v13 = vadd.f32 %v661_v5, %v613_v3  ;;  %v674_v14 = vadd.f32 %v673_v6, %v654_v4  ;;  %v618_v15 = vpop.f32.mrb[3].mxu1  ;;  %v659_v16 = vpop.f32.mrb[7].mxu0 }
 0x225   :  { %v668_v17 = vadd.f32 %v667_v9, %v615_v7  ;;  %v680_v18 = vadd.f32 %v679_v10, %v656_v8 }
 0x226   :  { %v663_v19 = vrot.slane %v662_v13, 2  ;;  %v675_v20 = vrot.slane %v674_v14, 2 }
 0x227   :  { %v669_v21 = vrot.slane %v668_v17, 2  ;;  %v681_v22 = vrot.slane %v680_v18, 2 }
 0x228   :  { %v664_v23 = vadd.f32 %v663_v19, %v662_v13  ;;  %v676_v24 = vadd.f32 %v675_v20, %v674_v14  ;;  %v759_v19 = vsub.s32 3, %v1152_v46  ;;  %v59_v20 = vld [vmem:[#allocation6 + $0x10] sm:$0xff] }
 0x229   :  { %v670_v25 = vadd.f32 %v669_v21, %v668_v17  ;;  %v682_v26 = vadd.f32 %v681_v22, %v680_v18  ;;  %v739_v18 = vsub.s32 2, %v1152_v46 }
 0x22a   :  { %v665_v27 = vrot.slane %v664_v23, 1  ;;  %v677_v28 = vrot.slane %v676_v24, 1 }
 0x22b   :  { %v671_v29 = vrot.slane %v670_v25, 1  ;;  %v683_v30 = vrot.slane %v682_v26, 1 }
 0x22c   :  { %v666_v31 = vadd.f32 %v665_v27, %v664_v23  ;;  %v678_v32 = vadd.f32 %v677_v28, %v676_v24  ;;  %v60_v24 = vld [vmem:[#allocation6 + $0x18] sm:$0xff] }
 0x22d   :  { %v672_v33 = vadd.f32 %v671_v29, %v670_v25  ;;  %v684_v34 = vadd.f32 %v683_v30, %v682_v26  ;;  %v760_v29 = vrot.slane %v1154_v47, %v759_v19 }
 0x22e   :  { %v685_v35 = vmul.f32 0.125, %v666_v31  ;;  %v687_v36 = vmul.f32 0.125, %v678_v32  ;;  %v783_v31 = vsub.s32 4, %v1152_v46 }
 0x22f   :  { %v686_v37 = vmul.f32 0.125, %v672_v33  ;;  %v688_v38 = vmul.f32 0.125, %v684_v34  ;;  %v768_v34 = vrot.slane %v59_v20, %v759_v19 }
 0x230   :  { %v689_v39 = vsub.f32 %v613_v3, %v685_v35  ;;  %v1164_v40 = vsub.f32 %v654_v4, %v687_v36 }
 0x231   :  { %v1166_v41 = vsub.f32 %v615_v7, %v686_v37  ;;  %v1168_v42 = vsub.f32 %v656_v8, %v688_v38  ;;  %v764_v37 = vrot.slane %v1157_v49, %v759_v19 }
 0x232   :  { %v693_v43 = vmul.f32 %v689_v39, %v689_v39  ;;  %v695_v44 = vmul.f32 %v1164_v40, %v1164_v40 }
 0x233   :  { %v694_v45 = vmul.f32 %v1166_v41, %v1166_v41  ;;  %v696_v48 = vmul.f32 %v1168_v42, %v1168_v42 }
 0x234   :  { %v697_v50 = vrot.slane %v693_v43, 4  ;;  %v709_v51 = vrot.slane %v695_v44, 4 }
 0x235   :  { %v703_v52 = vrot.slane %v694_v45, 4  ;;  %v715_v53 = vrot.slane %v696_v48, 4 }
 0x236   :  { %v698_v54 = vadd.f32 %v697_v50, %v693_v43  ;;  %v710_v55 = vadd.f32 %v709_v51, %v695_v44  ;;  %v772_v44 = vrot.slane %v60_v24, %v759_v19  ;;  %v784_v50 = vrot.slane %v1154_v47, %v783_v31 }
 0x237   :  { %v704_v56 = vadd.f32 %v703_v52, %v694_v45  ;;  %v716_v57 = vadd.f32 %v715_v53, %v696_v48 }
 0x238   :  { %v699_v58 = vrot.slane %v698_v54, 2  ;;  %v711_v59 = vrot.slane %v710_v55, 2 }
 0x239   :  { %v705_v60 = vrot.slane %v704_v56, 2  ;;  %v717_v61 = vrot.slane %v716_v57, 2 }
 0x23a   :  { %v700_v62 = vadd.f32 %v699_v58, %v698_v54  ;;  %v712_v63 = vadd.f32 %v711_v59, %v710_v55  ;;  %v788_v55 = vrot.slane %v1157_v49, %v783_v31  ;;  %v792_v58 = vrot.slane %v59_v20, %v783_v31 }
 0x23b   :  { %v706_v0 = vadd.f32 %v705_v60, %v704_v56  ;;  %v718_v1 = vadd.f32 %v717_v61, %v716_v57  ;;  %v796_v60 = vrot.slane %v60_v24, %v783_v31 }
 0x23c   :  { %v701_v2 = vrot.slane %v700_v62, 1  ;;  %v713_v3 = vrot.slane %v712_v63, 1 }
 0x23d   :  { %v707_v4 = vrot.slane %v706_v0, 1  ;;  %v719_v5 = vrot.slane %v718_v1, 1 }
 0x23e   :  { %v702_v6 = vadd.f32 %v701_v2, %v700_v62  ;;  %v714_v7 = vadd.f32 %v713_v3, %v712_v63 }
 0x23f   :  { %v708_v8 = vadd.f32 %v707_v4, %v706_v0  ;;  %v720_v9 = vadd.f32 %v719_v5, %v718_v1 }
 0x240   :  { %v721_v10 = vmul.f32 0.125, %v702_v6  ;;  %v723_v11 = vmul.f32 0.125, %v714_v7 }
 0x241   :  { %v722_v12 = vmul.f32 0.125, %v708_v8  ;;  %v724_v13 = vmul.f32 0.125, %v720_v9 }
 0x242   :  { %v725_v14 = vadd.f32 1e-05, %v721_v10  ;;  %v727_v15 = vadd.f32 1e-05, %v723_v11 }
 0x243   :  { %v726_v16 = vadd.f32 1e-05, %v722_v12  ;;  %v728_v17 = vadd.f32 1e-05, %v724_v13 }
 0x244   :  { %1002 = vrsqrt.f32 %v725_v14 }
 0x245   :  { %1004 = vrsqrt.f32 %v727_v15 }
 0x246   :  { %1006 = vrsqrt.f32 %v726_v16 }
 0x247   :  { %1008 = vrsqrt.f32 %v728_v17 }
 0x24e   :  { %v1003_v21 = vpop.eup %1002 }
 0x24f   :  { %v1005_v22 = vpop.eup %1004  ;;  %v733_v23 = vmul.f32 %v1003_v21, %v1154_v47 }
 0x250   :  { %v1007_v25 = vpop.eup %1006  ;;  %v735_v26 = vmul.f32 %v1005_v22, %v59_v20 }
 0x251   :  { %v1009_v27 = vpop.eup %1008  ;;  %v740_v28 = vrot.slane %v733_v23, %v739_v18  ;;  %v734_v30 = vmul.f32 %v1007_v25, %v1157_v49 }
 0x252   :  { %v748_v32 = vrot.slane %v735_v26, %v739_v18  ;;  %v736_v33 = vmul.f32 %v1009_v27, %v60_v24 }
 0x253   :  { %v753_v35 = vmul.f32 %v740_v28, %v689_v39  ;;  %v744_v36 = vrot.slane %v734_v30, %v739_v18 }
 0x254   :  { %v755_v38 = vmul.f32 %v748_v32, %v1164_v40  ;;  %v752_v43 = vrot.slane %v736_v33, %v739_v18 }
 0x255   :  { %v773_v45 = vadd.f32 %v760_v29, %v753_v35  ;;  %v754_v48 = vmul.f32 %v744_v36, %v1166_v41 }
 0x256   :  { %v756_v51 = vmul.f32 %v752_v43, %v1168_v42  ;;  %v775_v52 = vadd.f32 %v768_v34, %v755_v38  ;;  %v808_v42 = vsub.s32 5, %v1152_v46 }
 0x257   :  { %v774_v53 = vadd.f32 %v764_v37, %v754_v48  ;;  %v777_v54 = vmax.f32 %v773_v45, 0.0 }
 0x258   :  { %v776_v39 = vadd.f32 %v772_v44, %v756_v51  ;;  %v779_v57 = vmax.f32 %v775_v52, 0.0  ;;  %v809_v2 = vrot.slane %v1154_v47, %v808_v42 }
 0x259   :  { %v778_v56 = vmax.f32 %v774_v53, 0.0  ;;  %v797_v59 = vmul.f32 %v784_v50, %v777_v54 }
 0x25a   :  { %v780_v40 = vmax.f32 %v776_v39, 0.0  ;;  %v799_v62 = vmul.f32 %v792_v58, %v779_v57 }
 0x25b   :  { %v798_v61 = vmul.f32 %v788_v55, %v778_v56 }
 0x25c   :  { %v800_v41 = vmul.f32 %v796_v60, %v780_v40 }
 0x25d   :  { %v801_v63 = vadd.f32 %v798_v61, %v797_v59 }
 0x25f   :  { %v802_v0 = vadd.f32 %v801_v63, %v799_v62 }
 0x261   :  { %v803_v1 = vadd.f32 %v802_v0, %v800_v41 }
 0x263   :  { %804 = vadd.xlane.f32.xlu0 %v803_v1 }
 0x2f0   :  { %v805_v3 = vpop.xlane.xlu0 %804 }
 0x2f1   :  { %v810_v49 = vadd.f32 %v809_v2, %v805_v3 }
 0x2f3   :  { %812 = vst.msk [vmem:[%s1197_s4] sm:$0xff] %vm811_vm1, %v810_v49 }
 0x2f4   :  { %817 = vsyncpa [#allocation3], 1 }
 0x2f5   :  { %818 = vsyncpa [#allocation5], 1 }

</bundles_post_ra>
